<compile_context>
chip_gen: v5e
topology: v5e:2x2
jax: 0.10.0
libtpu: 0.0.40
codegen_flags: <defaults>
</compile_context>

<pallas_src>
import numpy as np
import jax
import jax.numpy as jnp
from jax.experimental import pallas as pl
from jax.experimental.pallas import tpu as pltpu


# ---------------------------------------------------------------------------
# Pallas kernels
# ---------------------------------------------------------------------------
def _points_cam2img_kernel(pts_ref, mat_ref, out_ref):
    """SoA projection: sublanes = (x, y, z, pad...), lanes = point index.

    mat_ref holds the row-major flattened 4x4 cam2img matrix in SMEM (only the
    first three rows are used).  All compute is VPU FMAs + one exact
    reciprocal; output rows 0/1/2 = u, v, depth (lane-dense stores).
    """
    pts = pts_ref[...]                       # (8, TN) f32
    x = pts[0:1, :]
    y = pts[1:2, :]
    z = pts[2:3, :]

    def m(i, j):                             # scalar from SMEM, broadcasts on VPU
        return mat_ref[4 * i + j]

    u = m(0, 0) * x + m(0, 1) * y + m(0, 2) * z + m(0, 3)
    v = m(1, 0) * x + m(1, 1) * y + m(1, 2) * z + m(1, 3)
    w = m(2, 0) * x + m(2, 1) * y + m(2, 2) * z + m(2, 3)

    # Guard padded lanes (x=y=z=0) against divide-by-zero; keep the exact
    # reciprocal (approx=True ~1e-3 error would violate the 1e-4 tolerance).
    r = 1.0 / jnp.where(w == 0.0, jnp.float32(1.0), w)

    out_ref[0:1, :] = u * r                  # image x
    out_ref[1:2, :] = v * r                  # image y
    out_ref[2:3, :] = w                      # depth
    out_ref[3:8, :] = jnp.zeros_like(pts[3:8, :])  # keep padded rows clean


def _label_remap_kernel(lab_ref, out_ref):
    lab = lab_ref[...]
    # {1,2,3} -> {2,0,1} via (lab+1)%3, everything else -> 3
    out_ref[...] = jnp.where((lab >= 1) & (lab <= 3), (lab + 1) % 3, 3)


# ---------------------------------------------------------------------------
# Module wrapper (mirrors MMDet3DHead)
# ---------------------------------------------------------------------------
class MMDet3DHeadPallas:
    _TN = 1024  # points per grid step (lane-tile), multiple of 128

    def __init__(self, strides, regress_ranges, feat_lvl):
        # mirrors the strides / regress_ranges slicing in the PyTorch __init__
        s = feat_lvl[0]
        self.strides = strides[s:s + len(feat_lvl)]
        self.regress_ranges = regress_ranges[s:s + len(feat_lvl)]
        # TODO(synk): build_head(model_cfg.cfg) builds an external mmdet3d bbox
        # head (conv tower) that is never called in forward(); not reproduced.

    # ------------------------------------------------------------------ #
    def forward(self, data_dict):
        # PyTorch forward() is a pure pass-through in both training and eval.
        return data_dict

    # ------------------------------------------------------------------ #
    def points_cam2img(self, points_3d, proj_mat, with_depth=False):
        """Pallas projection of camera-frame points to image coordinates."""
        points_3d = jnp.asarray(points_3d, jnp.float32)
        proj_mat = jnp.asarray(proj_mat, jnp.float32)
        n = points_3d.shape[0]

        # expand 3x3 / 3x4 projection matrices to 4x4 (same as the reference)
        d1, d2 = proj_mat.shape
        if d1 == 3:
            pm = jnp.eye(4, dtype=jnp.float32).at[:d1, :d2].set(proj_mat)
        else:
            pm = proj_mat
        mat_flat = pm.reshape(16)            # 16 scalars -> SMEM

        # bucket N to a power of two (>= one tile) so distinct point counts
        # reuse the same compiled kernel
        tn = self._TN
        n_pad = max(tn, int(pl.next_power_of_2(max(n, 1))))
        grid_n = n_pad // tn

        # SoA: sublanes 0..2 = x/y/z, lanes = point index.  Homogeneous 1 is
        # not stored; the translation column is added inside the kernel.
        pts = jnp.pad(points_3d.T, ((0, 5), (0, n_pad - n)))  # (8, n_pad)

        out = pl.pallas_call(
            _points_cam2img_kernel,
            out_shape=jax.ShapeDtypeStruct((8, n_pad), jnp.float32),
            grid=(grid_n,),
            in_specs=[
                pl.BlockSpec((8, tn), lambda i: (0, i)),
                pl.BlockSpec(memory_space=pltpu.MemorySpace.SMEM),
            ],
            out_specs=pl.BlockSpec((8, tn), lambda i: (0, i)),
            compiler_params=pltpu.CompilerParams(
                dimension_semantics=("parallel",)),
        )(pts, mat_flat)

        proj = out[:3, :n].T                 # (n, 3): u, v, depth
        return proj if with_depth else proj[:, :2]

    # ------------------------------------------------------------------ #
    def pcdet2mmdet_label(self, pcdet_label):
        """Pallas elementwise remap of pcdet class ids to mmdet class ids."""
        lab = jnp.asarray(pcdet_label, jnp.int32)
        b, m = lab.shape
        b_pad = max(8, -(-b // 8) * 8)
        m_pad = max(128, -(-m // 128) * 128)
        lab_p = jnp.pad(lab, ((0, b_pad - b), (0, m_pad - m)))

        out = pl.pallas_call(
            _label_remap_kernel,
            out_shape=jax.ShapeDtypeStruct((b_pad, m_pad), jnp.int32),
        )(lab_p)

        mmdet_labels = out[:b, :m]
        # reference returns torch.unbind -> tuple of per-batch label vectors
        if hasattr(jnp, "unstack"):
            return tuple(jnp.unstack(mmdet_labels, axis=0))
        return tuple(mmdet_labels[i] for i in range(b))


# ---------------------------------------------------------------------------
# main
# ---------------------------------------------------------------------------
if __name__ == "__main__":
    key = jax.random.PRNGKey(0)
    k1, k2, k3 = jax.random.split(key, 3)

    head = MMDet3DHeadPallas(
        strides=(4, 8, 16, 32, 64),
        regress_ranges=((-1, 48), (48, 96), (96, 192), (192, 384), (384, 1e8)),
        feat_lvl=[1, 2, 3],
    )

    # --- forward(): pass-through on a small synthetic data_dict -----------
    img_feats = jax.random.normal(k1, (2, 4, 16, 16), jnp.float32)  # NCHW feats
    data_dict = {"img_feats": img_feats}
    out_dict = head.forward(data_dict)
    assert out_dict is data_dict  # exact pass-through semantics

    # --- points_cam2img kernel --------------------------------------------
    n_pts = 8
    points_3d = jax.random.normal(k2, (n_pts, 3), jnp.float32) * 5.0
    points_3d = points_3d.at[:, 2].set(jnp.abs(points_3d[:, 2]) + 2.0)  # z > 0
    # deterministic KITTI-like cam2img (4x4)
    proj_mat = jnp.array(
        [[700.0, 0.0, 600.0, 45.0],
         [0.0, 700.0, 180.0, -0.3],
         [0.0, 0.0, 1.0, 0.005],
         [0.0, 0.0, 0.0, 1.0]], jnp.float32)

    proj = head.points_cam2img(points_3d, proj_mat, with_depth=True)
    proj = jax.block_until_ready(proj)

    # pure-JAX reference
    pts4_ref = jnp.concatenate([points_3d, jnp.ones((n_pts, 1), jnp.float32)], -1)
    p2d_ref = pts4_ref @ proj_mat.T
    ref = jnp.concatenate([p2d_ref[:, :2] / p2d_ref[:, 2:3], p2d_ref[:, 2:3]], -1)
    np.testing.assert_allclose(np.asarray(proj), np.asarray(ref),
                               rtol=1e-4, atol=1e-4)

    # also exercise the with_depth=False path
    proj2d = jax.block_until_ready(head.points_cam2img(points_3d, proj_mat))
    np.testing.assert_allclose(np.asarray(proj2d), np.asarray(ref[:, :2]),
                               rtol=1e-4, atol=1e-4)

    # --- pcdet2mmdet_label kernel ------------------------------------------
    pcdet_labels = jax.random.randint(k3, (2, 8), 0, 4, jnp.int32)
    remapped = head.pcdet2mmdet_label(pcdet_labels)
    remapped = jax.block_until_ready(jnp.stack(remapped))

    lab_np = np.asarray(pcdet_labels)
    ref_lab = np.full_like(lab_np, 3)
    ref_lab[lab_np == 1] = 2
    ref_lab[lab_np == 2] = 0
    ref_lab[lab_np == 3] = 1
    np.testing.assert_array_equal(np.asarray(remapped), ref_lab)

    print("KERNEL_OK")
</pallas_src>

<mosaic_0001>
module attributes {stable_mosaic.version = 11 : i64} {
  func.func @_points_cam2img_kernel(%arg0: i32, %arg1: memref<8x1024xf32, #tpu.memory_space<vmem>>, %arg2: memref<16xf32, #tpu.memory_space<smem>>, %arg3: memref<8x1024xf32, #tpu.memory_space<vmem>>) attributes {dimension_semantics = [#tpu.dimension_semantics<parallel>], iteration_bounds = array<i64: 1>, scalar_prefetch = 0 : i64, scratch_operands = 0 : i64, tpu.core_type = #tpu.core_type<tc>, window_params = [{transform_indices = @transform_0, window_bounds = array<i64: 8, 1024>}, {transform_indices = @transform_1, window_bounds = array<i64: 16>}, {transform_indices = @transform_2, window_bounds = array<i64: 8, 1024>}]} {
    %c0 = arith.constant 0 : index
    %c0_0 = arith.constant 0 : index
    %0 = vector.load %arg1[%c0, %c0_0] : memref<8x1024xf32, #tpu.memory_space<vmem>>, vector<8x1024xf32>
    %1 = vector.extract_strided_slice %0 {offsets = [0, 0], sizes = [1, 1024], strides = [1, 1]} : vector<8x1024xf32> to vector<1x1024xf32>
    %2 = vector.extract_strided_slice %0 {offsets = [1, 0], sizes = [1, 1024], strides = [1, 1]} : vector<8x1024xf32> to vector<1x1024xf32>
    %3 = vector.extract_strided_slice %0 {offsets = [2, 0], sizes = [1, 1024], strides = [1, 1]} : vector<8x1024xf32> to vector<1x1024xf32>
    %c0_1 = arith.constant 0 : index
    %4 = memref.load %arg2[%c0_1] : memref<16xf32, #tpu.memory_space<smem>>
    %5 = vector.broadcast %4 : f32 to vector<1x1024xf32>
    %6 = arith.mulf %5, %1 : vector<1x1024xf32>
    %c1 = arith.constant 1 : index
    %7 = memref.load %arg2[%c1] : memref<16xf32, #tpu.memory_space<smem>>
    %8 = vector.broadcast %7 : f32 to vector<1x1024xf32>
    %9 = arith.mulf %8, %2 : vector<1x1024xf32>
    %10 = arith.addf %6, %9 : vector<1x1024xf32>
    %c2 = arith.constant 2 : index
    %11 = memref.load %arg2[%c2] : memref<16xf32, #tpu.memory_space<smem>>
    %12 = vector.broadcast %11 : f32 to vector<1x1024xf32>
    %13 = arith.mulf %12, %3 : vector<1x1024xf32>
    %14 = arith.addf %10, %13 : vector<1x1024xf32>
    %c3 = arith.constant 3 : index
    %15 = memref.load %arg2[%c3] : memref<16xf32, #tpu.memory_space<smem>>
    %16 = vector.broadcast %15 : f32 to vector<1x1024xf32>
    %17 = arith.addf %14, %16 : vector<1x1024xf32>
    %c4 = arith.constant 4 : index
    %18 = memref.load %arg2[%c4] : memref<16xf32, #tpu.memory_space<smem>>
    %19 = vector.broadcast %18 : f32 to vector<1x1024xf32>
    %20 = arith.mulf %19, %1 : vector<1x1024xf32>
    %c5 = arith.constant 5 : index
    %21 = memref.load %arg2[%c5] : memref<16xf32, #tpu.memory_space<smem>>
    %22 = vector.broadcast %21 : f32 to vector<1x1024xf32>
    %23 = arith.mulf %22, %2 : vector<1x1024xf32>
    %24 = arith.addf %20, %23 : vector<1x1024xf32>
    %c6 = arith.constant 6 : index
    %25 = memref.load %arg2[%c6] : memref<16xf32, #tpu.memory_space<smem>>
    %26 = vector.broadcast %25 : f32 to vector<1x1024xf32>
    %27 = arith.mulf %26, %3 : vector<1x1024xf32>
    %28 = arith.addf %24, %27 : vector<1x1024xf32>
    %c7 = arith.constant 7 : index
    %29 = memref.load %arg2[%c7] : memref<16xf32, #tpu.memory_space<smem>>
    %30 = vector.broadcast %29 : f32 to vector<1x1024xf32>
    %31 = arith.addf %28, %30 : vector<1x1024xf32>
    %c8 = arith.constant 8 : index
    %32 = memref.load %arg2[%c8] : memref<16xf32, #tpu.memory_space<smem>>
    %33 = vector.broadcast %32 : f32 to vector<1x1024xf32>
    %34 = arith.mulf %33, %1 : vector<1x1024xf32>
    %c9 = arith.constant 9 : index
    %35 = memref.load %arg2[%c9] : memref<16xf32, #tpu.memory_space<smem>>
    %36 = vector.broadcast %35 : f32 to vector<1x1024xf32>
    %37 = arith.mulf %36, %2 : vector<1x1024xf32>
    %38 = arith.addf %34, %37 : vector<1x1024xf32>
    %c10 = arith.constant 10 : index
    %39 = memref.load %arg2[%c10] : memref<16xf32, #tpu.memory_space<smem>>
    %40 = vector.broadcast %39 : f32 to vector<1x1024xf32>
    %41 = arith.mulf %40, %3 : vector<1x1024xf32>
    %42 = arith.addf %38, %41 : vector<1x1024xf32>
    %c11 = arith.constant 11 : index
    %43 = memref.load %arg2[%c11] : memref<16xf32, #tpu.memory_space<smem>>
    %44 = vector.broadcast %43 : f32 to vector<1x1024xf32>
    %45 = arith.addf %42, %44 : vector<1x1024xf32>
    %cst = arith.constant 0.000000e+00 : f32
    %46 = vector.broadcast %cst : f32 to vector<1x1024xf32>
    %47 = arith.cmpf oeq, %45, %46 : vector<1x1024xf32>
    %cst_2 = arith.constant 1.000000e+00 : f32
    %48 = vector.broadcast %cst_2 : f32 to vector<1x1024xf32>
    %49 = arith.select %47, %48, %45 : vector<1x1024xi1>, vector<1x1024xf32>
    %cst_3 = arith.constant 1.000000e+00 : f32
    %50 = vector.broadcast %cst_3 : f32 to vector<1x1024xf32>
    %51 = arith.divf %50, %49 : vector<1x1024xf32>
    %52 = arith.mulf %17, %51 : vector<1x1024xf32>
    %c0_4 = arith.constant 0 : index
    %c0_5 = arith.constant 0 : index
    %53 = vector.load %arg3[%c0_4, %c0_5] : memref<8x1024xf32, #tpu.memory_space<vmem>>, vector<1x1024xf32>
    tpu.vector_store %arg3[%c0_4, %c0_5], %52 {strides = array<i32>} : memref<8x1024xf32, #tpu.memory_space<vmem>>, vector<1x1024xf32>,
    %54 = arith.mulf %31, %51 : vector<1x1024xf32>
    %c1_6 = arith.constant 1 : index
    %c0_7 = arith.constant 0 : index
    %55 = vector.load %arg3[%c1_6, %c0_7] : memref<8x1024xf32, #tpu.memory_space<vmem>>, vector<1x1024xf32>
    tpu.vector_store %arg3[%c1_6, %c0_7], %54 {strides = array<i32>} : memref<8x1024xf32, #tpu.memory_space<vmem>>, vector<1x1024xf32>,
    %c2_8 = arith.constant 2 : index
    %c0_9 = arith.constant 0 : index
    %56 = vector.load %arg3[%c2_8, %c0_9] : memref<8x1024xf32, #tpu.memory_space<vmem>>, vector<1x1024xf32>
    tpu.vector_store %arg3[%c2_8, %c0_9], %45 {strides = array<i32>} : memref<8x1024xf32, #tpu.memory_space<vmem>>, vector<1x1024xf32>,
    %cst_10 = arith.constant 0.000000e+00 : f32
    %57 = vector.broadcast %cst_10 : f32 to vector<5x1024xf32>
    %c3_11 = arith.constant 3 : index
    %c0_12 = arith.constant 0 : index
    %58 = vector.load %arg3[%c3_11, %c0_12] : memref<8x1024xf32, #tpu.memory_space<vmem>>, vector<5x1024xf32>
    tpu.vector_store %arg3[%c3_11, %c0_12], %57 {strides = array<i32>} : memref<8x1024xf32, #tpu.memory_space<vmem>>, vector<5x1024xf32>,
    return
  }
  func.func @transform_0(%arg0: i32) -> (i32, i32) {
    %c0_i32 = arith.constant 0 : i32
    %c0_i32_0 = arith.constant 0 : i32
    return %c0_i32, %arg0 : i32, i32
  }
  func.func @transform_1(%arg0: i32) -> i32 {
    %c0_i32 = arith.constant 0 : i32
    %c0_i32_0 = arith.constant 0 : i32
    return %c0_i32 : i32
  }
  func.func @transform_2(%arg0: i32) -> (i32, i32) {
    %c0_i32 = arith.constant 0 : i32
    %c0_i32_0 = arith.constant 0 : i32
    return %c0_i32, %arg0 : i32, i32
  }
}

</mosaic_0001>

<bundles_post_ra>
// kernel: tpu_custom_call.1
= control target key start
LH: loop header
LB: loop body
LE: loop exit
PB: predicated region body
PF: predicated region fallthrough
CT: control target
= control target key end

     0   :  { %7 = vsyncpa [#allocation3], 0  ;;  %s1225_s0 = inlined_call_operand.hbm [shape: f32[8,1024], index: 0, kind: input, shape index: {}]   ;;  %s1226_s1 = inlined_call_operand.hbm [shape: f32[16], index: 1, kind: input, shape index: {}]   ;;  %s1227_s2 = inlined_call_operand.hbm [shape: f32[8,1024], index: 2, kind: output, shape index: {}]  }
   0x1   :  { %8 = vsyncpa [#allocation5], 0 }
   0x2   :  { %9 = vsyncpa [#allocation4], 0  ;;  %s15_s11 = sshll.u32 %s1225_s0, 4  ;;  %s718_s12 = smov [#allocation2]   ;;  %s16_s11 = int_to_ptr.hbm [resolvable:$true] %s15_s11 }
   0x3   :  { %s17_s13 = sshll.u32 %s718_s12, 4  ;;  %s26_s16 = sshll.u32 %s1226_s1, 4  ;;  %s18_s13 = int_to_ptr.vmem [resolvable:$true] %s17_s13  ;;  %s27_s16 = int_to_ptr.hbm [resolvable:$true] %s26_s16 }
   0x4   :  { %20 = dma.hbm_to_vmem [thread:$0]  %s16_s11, 1024, %s18_s13, [#allocation3]  }
   0x5   :  { %s719_s17 = smov [#allocation6]  }
   0x6   :  { %29 = dma.hbm_to_smem %s27_s16, 16, %s719_s17, [#allocation5]  }
   0x7   :  { %712 = dma.done.wait [#allocation3], 1024  }
   0x8   :  { %713 = vsyncadd [#allocation3], 4294966272 }
   0x9   :  { %714 = dma.done.wait [#allocation5], 16  }
   0xa   :  { %715 = vsyncadd [#allocation5], 4294967280 }
   0xb   :  { %38 = sfence }
   0xc   :  { %s47_s18 = sld [smem:[#allocation6]]  ;;  %v743_v0 = vld [vmem:[#allocation2] sm:$0xff]  ;;  %v745_v1 = vld [vmem:[#allocation2 + $0x8] sm:$0xff]  ;;  %v747_v2 = vld [vmem:[#allocation2 + $0x10] sm:$0xff]  ;;  %s721_s28 = smov [#allocation7]  }
   0xd   :  { %s621_s19 = sld [smem:[#allocation6 + $0x1]]  ;;  %v749_v4 = vld [vmem:[#allocation2 + $0x18] sm:$0xff]  ;;  %v751_v5 = vld [vmem:[#allocation2 + $0x20] sm:$0xff]  ;;  %v753_v6 = vld [vmem:[#allocation2 + $0x28] sm:$0xff]  ;;  %s608_s29 = sshll.u32 %s721_s28, 4  ;;  %s609_s29 = int_to_ptr.vmem [resolvable:$true] %s608_s29 }
   0xe   :  { %s622_s0 = sld [smem:[#allocation6 + $0x2]]  ;;  %v757_v9 = vld [vmem:[#allocation2 + $0x30] sm:$0xff]  ;;  %v759_v10 = vld [vmem:[#allocation2 + $0x38] sm:$0xff]  ;;  %s610_s4 = sshll.u32 %s1227_s2, 4  ;;  %s611_s4 = int_to_ptr.hbm [resolvable:$true] %s610_s4 }
   0xf   :  { %s775_s1 = sld [smem:[#allocation6 + $0x3]] }
  0x10   :  { %s777_s20 = sld [smem:[#allocation6 + $0x8]] }
  0x11   :  { %s779_s21 = sld [smem:[#allocation6 + $0x9]] }
  0x12   :  { %v48_v3 = vstv %s47_s18  ;;  %s781_s22 = sld [smem:[#allocation6 + $0xa]] }
  0x13   :  { %v49_v7 = vmul.f32 %v48_v3, %v743_v0  ;;  %v50_v8 = vmul.f32 %v48_v3, %v745_v1  ;;  %v51_v11 = vmul.f32 %v48_v3, %v747_v2  ;;  %v52_v12 = vmul.f32 %v48_v3, %v749_v4  ;;  %s631_s23 = sld [smem:[#allocation6 + $0xb]] }
  0x14   :  { %v53_v13 = vmul.f32 %v48_v3, %v751_v5  ;;  %v54_v14 = vmul.f32 %v48_v3, %v753_v6  ;;  %v55_v15 = vmul.f32 %v48_v3, %v757_v9  ;;  %v56_v16 = vmul.f32 %v48_v3, %v759_v10  ;;  %s1105_s24 = sld [smem:[#allocation6 + $0x4]] }
  0x15   :  { %v58_v17 = vstv %s621_s19  ;;  %v100_v18 = vstv %s622_s0  ;;  %v792_v60 = vstv %s775_s1  ;;  %s1115_s25 = sld [smem:[#allocation6 + $0x5]] }
  0x16   :  { %v59_v19 = vmul.f32 %v58_v17, %v743_v0  ;;  %v60_v20 = vmul.f32 %v58_v17, %v745_v1  ;;  %v61_v21 = vmul.f32 %v58_v17, %v747_v2  ;;  %v62_v22 = vmul.f32 %v58_v17, %v749_v4  ;;  %s1124_s26 = sld [smem:[#allocation6 + $0x6]] }
  0x17   :  { %v63_v23 = vmul.f32 %v58_v17, %v751_v5  ;;  %v64_v24 = vmul.f32 %v58_v17, %v753_v6  ;;  %v65_v25 = vmul.f32 %v58_v17, %v757_v9  ;;  %v66_v26 = vmul.f32 %v58_v17, %v759_v10  ;;  %s1177_s27 = sld [smem:[#allocation6 + $0x7]] }
  0x18   :  { %v75_v27 = vrot.slane %v59_v19, 1  ;;  %v76_v28 = vrot.slane %v60_v20, 1  ;;  %v77_v29 = vrot.slane %v61_v21, 1  ;;  %v78_v30 = vrot.slane %v62_v22, 1 }
  0x19   :  { %v79_v31 = vrot.slane %v63_v23, 1  ;;  %v80_v32 = vrot.slane %v64_v24, 1  ;;  %v81_v33 = vrot.slane %v65_v25, 1  ;;  %v82_v34 = vrot.slane %v66_v26, 1 }
  0x1a   :  { %v91_v35 = vadd.f32 %v75_v27, %v49_v7  ;;  %v92_v36 = vadd.f32 %v76_v28, %v50_v8  ;;  %v93_v37 = vadd.f32 %v77_v29, %v51_v11  ;;  %v94_v38 = vadd.f32 %v78_v30, %v52_v12 }
  0x1b   :  { %v95_v39 = vadd.f32 %v79_v31, %v53_v13  ;;  %v96_v40 = vadd.f32 %v80_v32, %v54_v14  ;;  %v97_v41 = vadd.f32 %v81_v33, %v55_v15  ;;  %v98_v42 = vadd.f32 %v82_v34, %v56_v16 }
  0x1c   :  { %v101_v43 = vmul.f32 %v100_v18, %v743_v0  ;;  %v102_v44 = vmul.f32 %v100_v18, %v745_v1  ;;  %v103_v45 = vmul.f32 %v100_v18, %v747_v2  ;;  %v104_v46 = vmul.f32 %v100_v18, %v749_v4 }
  0x1d   :  { %v105_v47 = vmul.f32 %v100_v18, %v751_v5  ;;  %v106_v48 = vmul.f32 %v100_v18, %v753_v6  ;;  %v107_v49 = vmul.f32 %v100_v18, %v757_v9  ;;  %v108_v50 = vmul.f32 %v100_v18, %v759_v10 }
  0x1e   :  { %v117_v51 = vrot.slane %v101_v43, 2  ;;  %v118_v52 = vrot.slane %v102_v44, 2  ;;  %v119_v53 = vrot.slane %v103_v45, 2  ;;  %v120_v54 = vrot.slane %v104_v46, 2 }
  0x1f   :  { %v121_v55 = vrot.slane %v105_v47, 2  ;;  %v122_v56 = vrot.slane %v106_v48, 2  ;;  %v123_v57 = vrot.slane %v107_v49, 2  ;;  %v124_v58 = vrot.slane %v108_v50, 2 }
  0x20   :  { %v133_v59 = vadd.f32 %v117_v51, %v91_v35  ;;  %v794_v61 = vadd.f32 %v118_v52, %v92_v36  ;;  %v796_v62 = vadd.f32 %v119_v53, %v93_v37  ;;  %v798_v63 = vadd.f32 %v120_v54, %v94_v38 }
  0x21   :  { %v800_v3 = vadd.f32 %v121_v55, %v95_v39  ;;  %v802_v7 = vadd.f32 %v122_v56, %v96_v40  ;;  %v804_v8 = vadd.f32 %v123_v57, %v97_v41  ;;  %v806_v11 = vadd.f32 %v124_v58, %v98_v42 }
  0x22   :  { %v809_v12 = vadd.f32 %v792_v60, %v133_v59  ;;  %v256_v13 = vstv %s777_s20  ;;  %v266_v14 = vstv %s779_s21  ;;  %v308_v15 = vstv %s781_s22 }
  0x23   :  { %v814_v16 = vstv %s631_s23  ;;  %v257_v17 = vmul.f32 %v256_v13, %v743_v0  ;;  %v258_v18 = vmul.f32 %v256_v13, %v745_v1  ;;  %v259_v19 = vmul.f32 %v256_v13, %v747_v2 }
  0x24   :  { %v260_v20 = vmul.f32 %v256_v13, %v749_v4  ;;  %v261_v21 = vmul.f32 %v256_v13, %v751_v5  ;;  %v262_v22 = vmul.f32 %v256_v13, %v753_v6  ;;  %v263_v23 = vmul.f32 %v256_v13, %v757_v9 }
  0x25   :  { %v264_v24 = vmul.f32 %v256_v13, %v759_v10  ;;  %v267_v25 = vmul.f32 %v266_v14, %v743_v0  ;;  %v268_v26 = vmul.f32 %v266_v14, %v745_v1  ;;  %v269_v27 = vmul.f32 %v266_v14, %v747_v2 }
  0x26   :  { %v270_v28 = vmul.f32 %v266_v14, %v749_v4  ;;  %v271_v29 = vmul.f32 %v266_v14, %v751_v5  ;;  %v272_v30 = vmul.f32 %v266_v14, %v753_v6  ;;  %v273_v31 = vmul.f32 %v266_v14, %v757_v9 }
  0x27   :  { %v274_v32 = vmul.f32 %v266_v14, %v759_v10  ;;  %v283_v33 = vrot.slane %v267_v25, 1  ;;  %v284_v34 = vrot.slane %v268_v26, 1  ;;  %v285_v35 = vrot.slane %v269_v27, 1 }
  0x28   :  { %v286_v36 = vrot.slane %v270_v28, 1  ;;  %v287_v37 = vrot.slane %v271_v29, 1  ;;  %v288_v38 = vrot.slane %v272_v30, 1  ;;  %v289_v39 = vrot.slane %v273_v31, 1 }
  0x29   :  { %v290_v40 = vrot.slane %v274_v32, 1  ;;  %v299_v41 = vadd.f32 %v283_v33, %v257_v17  ;;  %v300_v42 = vadd.f32 %v284_v34, %v258_v18  ;;  %v301_v43 = vadd.f32 %v285_v35, %v259_v19 }
  0x2a   :  { %v302_v44 = vadd.f32 %v286_v36, %v260_v20  ;;  %v303_v45 = vadd.f32 %v287_v37, %v261_v21  ;;  %v304_v46 = vadd.f32 %v288_v38, %v262_v22  ;;  %v305_v47 = vadd.f32 %v289_v39, %v263_v23 }
  0x2b   :  { %v306_v48 = vadd.f32 %v290_v40, %v264_v24  ;;  %v309_v49 = vmul.f32 %v308_v15, %v743_v0  ;;  %v310_v50 = vmul.f32 %v308_v15, %v745_v1  ;;  %v311_v51 = vmul.f32 %v308_v15, %v747_v2 }
  0x2c   :  { %v312_v52 = vmul.f32 %v308_v15, %v749_v4  ;;  %v313_v53 = vmul.f32 %v308_v15, %v751_v5  ;;  %v314_v54 = vmul.f32 %v308_v15, %v753_v6  ;;  %v315_v55 = vmul.f32 %v308_v15, %v757_v9 }
  0x2d   :  { %v316_v56 = vmul.f32 %v308_v15, %v759_v10  ;;  %v325_v57 = vrot.slane %v309_v49, 2  ;;  %v326_v58 = vrot.slane %v310_v50, 2  ;;  %v327_v59 = vrot.slane %v311_v51, 2 }
  0x2e   :  { %v328_v13 = vrot.slane %v312_v52, 2  ;;  %v329_v14 = vrot.slane %v313_v53, 2  ;;  %v330_v17 = vrot.slane %v314_v54, 2  ;;  %v331_v18 = vrot.slane %v315_v55, 2 }
  0x2f   :  { %v332_v19 = vrot.slane %v316_v56, 2  ;;  %v341_v20 = vadd.f32 %v325_v57, %v299_v41  ;;  %v342_v21 = vadd.f32 %v326_v58, %v300_v42  ;;  %v343_v22 = vadd.f32 %v327_v59, %v301_v43 }
  0x30   :  { %v344_v23 = vadd.f32 %v328_v13, %v302_v44  ;;  %v345_v24 = vadd.f32 %v329_v14, %v303_v45  ;;  %v346_v25 = vadd.f32 %v330_v17, %v304_v46  ;;  %v347_v26 = vadd.f32 %v331_v18, %v305_v47 }
  0x31   :  { %v348_v27 = vadd.f32 %v332_v19, %v306_v48  ;;  %v841_v28 = vadd.f32 %v814_v16, %v341_v20  ;;  %v844_v15 = vadd.f32 %v814_v16, %v342_v21  ;;  %v847_v29 = vadd.f32 %v814_v16, %v343_v22 }
  0x32   :  { %v850_v30 = vadd.f32 %v814_v16, %v344_v23  ;;  %v853_v31 = vadd.f32 %v814_v16, %v345_v24  ;;  %v856_v32 = vadd.f32 %v814_v16, %v346_v25  ;;  %v859_v33 = vadd.f32 %v814_v16, %v347_v26 }
  0x33   :  { %1229 = vst [vmem:[#allocation11_spill] sm:$0xff] %v841_v28  ;;  %v862_v34 = vadd.f32 %v814_v16, %v348_v27  ;;  %v866_v35 = vadd.f32 %v792_v60, %v794_v61  ;;  %vm359_vm0 = vcmp.eq.f32.partialorder %v841_v28, 0.0  ;;  %vm360_vm1 = vcmp.eq.f32.partialorder %v844_v15, 0.0 }
  0x34   :  { %vm361_vm2 = vcmp.eq.f32.partialorder %v847_v29, 0.0  ;;  %v873_v36 = vadd.f32 %v792_v60, %v796_v62  ;;  %v877_v37 = vadd.f32 %v792_v60, %v798_v63  ;;  %v881_v16 = vadd.f32 %v792_v60, %v800_v3 }
  0x35   :  { %v885_v61 = vadd.f32 %v792_v60, %v802_v7  ;;  %vm362_vm3 = vcmp.eq.f32.partialorder %v850_v30, 0.0  ;;  %vm363_vm4 = vcmp.eq.f32.partialorder %v853_v31, 0.0  ;;  %v890_v38 = vsel %vm359_vm0, 1.0, %v841_v28 }
  0x36   :  { %v893_v62 = vsel %vm360_vm1, 1.0, %v844_v15  ;;  %vm364_vm5 = vcmp.eq.f32.partialorder %v856_v32, 0.0  ;;  %vm365_vm6 = vcmp.eq.f32.partialorder %v859_v33, 0.0  ;;  %vm366_vm7 = vcmp.eq.f32.partialorder %v862_v34, 0.0 }
  0x37   :  { %v899_v63 = vsel %vm361_vm2, 1.0, %v847_v29  ;;  %v903_v3 = vadd.f32 %v792_v60, %v804_v8  ;;  %v907_v7 = vadd.f32 %v792_v60, %v806_v11  ;;  %636 = vrcp.f32 %v890_v38 }
  0x38   :  { %v386_v39 = vand.u32 2147483648, %v890_v38  ;;  %v912_v40 = vsel %vm362_vm3, 1.0, %v850_v30  ;;  %v915_v41 = vsel %vm363_vm4, 1.0, %v853_v31  ;;  %638 = vrcp.f32 %v893_v62 }
  0x39   :  { %v401_v42 = vand.u32 2147483648, %v893_v62  ;;  %v920_v8 = vsel %vm364_vm5, 1.0, %v856_v32  ;;  %v923_v60 = vsel %vm365_vm6, 1.0, %v859_v33  ;;  %v926_v11 = vsel %vm366_vm7, 1.0, %v862_v34 }
  0x3a   :  { %640 = vrcp.f32 %v899_v63  ;;  %vm380_vm8 = vweird.f32 %v890_v38  ;;  %v384_v43 = vand.u32 2147483647, %v890_v38  ;;  %v399_v44 = vand.u32 2147483647, %v893_v62 }
  0x3b   :  { %v416_v45 = vand.u32 2147483648, %v899_v63  ;;  %v933_v46 = vor.u32 1.1754944e-38, %v386_v39  ;;  %vm395_vm9 = vweird.f32 %v893_v62  ;;  %642 = vrcp.f32 %v912_v40 }
  0x3c   :  { %v431_v47 = vand.u32 2147483648, %v912_v40  ;;  %v938_v48 = vor.u32 1.1754944e-38, %v401_v42  ;;  %vm410_vm10 = vweird.f32 %v899_v63  ;;  %v414_v49 = vand.u32 2147483647, %v899_v63 }
  0x3d   :  { %644 = vrcp.f32 %v915_v41  ;;  %v943_v50 = vpop.eup %636  ;;  %vm425_vm11 = vweird.f32 %v912_v40  ;;  %v429_v51 = vand.u32 2147483647, %v912_v40  ;;  %v444_v52 = vand.u32 2147483647, %v915_v41 }
  0x3e   :  { %v446_v53 = vand.u32 2147483648, %v915_v41  ;;  %v949_v54 = vpop.eup %638  ;;  %v376_v55 = vmul.f32 %v943_v50, %v890_v38  ;;  %vm953_vm12 = vcmp.eq.f32.partialorder %v384_v43, 8.507059e+37  ;;  %vm957_vm13 = vcmp.eq.f32.partialorder %v399_v44, 8.507059e+37 }
  0x3f   :  { %v961_v58 = vor.u32 1.1754944e-38, %v416_v45  ;;  %646 = vrcp.f32 %v920_v8  ;;  %vm381_vm15 = vweird.f32 %v943_v50  ;;  %v391_v13 = vmul.f32 %v949_v54, %v893_v62 }
  0x40   :  { %v965_v59 = vpop.eup %640  ;;  %v970_v14 = vor.u32 1.1754944e-38, %v431_v47  ;;  %v377_v17 = vsub.f32 1.0, %v376_v55  ;;  %vm396_vm1 = vweird.f32 %v949_v54  ;;  %vm976_vm2 = vcmp.eq.f32.partialorder %v414_v49, 8.507059e+37  ;;  %vm998_vm6 = vmor %vm380_vm8, %vm381_vm15 }
  0x41   :  { %v406_v18 = vmul.f32 %v965_v59, %v899_v63  ;;  %v447_v20 = vor.u32 1.1754944e-38, %v446_v53  ;;  %v643_v21 = vpop.eup %642  ;;  %v392_v22 = vsub.f32 1.0, %v391_v13  ;;  %vm411_vm3 = vweird.f32 %v965_v59  ;;  %vm1010_vm14 = vmor %vm395_vm9, %vm396_vm1 }
  0x42   :  { %vm981_vm4 = vcmp.eq.f32.partialorder %v429_v51, 8.507059e+37  ;;  %vm985_vm5 = vcmp.eq.f32.partialorder %v444_v52, 8.507059e+37  ;;  %v459_v25 = vand.u32 2147483647, %v920_v8  ;;  %648 = vrcp.f32 %v923_v60  ;;  %vm1020_vm15 = vmor %vm410_vm10, %vm411_vm3 }
  0x43   :  { %v645_v26 = vpop.eup %644  ;;  %v378_v27 = vmul.f32 %v943_v50, %v377_v17  ;;  %v407_v39 = vsub.f32 1.0, %v406_v18  ;;  %v421_v42 = vmul.f32 %v643_v21, %v912_v40  ;;  %v461_v43 = vand.u32 2147483648, %v920_v8 }
  0x44   :  { %v393_v45 = vmul.f32 %v949_v54, %v392_v22  ;;  %vm426_vm7 = vweird.f32 %v643_v21  ;;  %v436_v47 = vmul.f32 %v645_v26, %v915_v41  ;;  %vm470_vm0 = vweird.f32 %v923_v60 }
  0x45   :  { %v647_v49 = vpop.eup %646  ;;  %v379_v51 = vadd.f32 %v943_v50, %v378_v27  ;;  %v408_v52 = vmul.f32 %v965_v59, %v407_v39  ;;  %v422_v53 = vsub.f32 1.0, %v421_v42  ;;  %vm441_vm8 = vweird.f32 %v645_v26  ;;  %vm1039_vm10 = vmor %vm425_vm11, %vm426_vm7 }
  0x46   :  { %v394_v55 = vadd.f32 %v949_v54, %v393_v45  ;;  %v437_v17 = vsub.f32 1.0, %v436_v47  ;;  %v451_v62 = vmul.f32 %v647_v49, %v920_v8  ;;  %vm1025_vm9 = vcmp.eq.f32.partialorder %v459_v25, 8.507059e+37 }
  0x47   :  { %v383_v22 = vsel %vm998_vm6, %v943_v50, %v379_v51  ;;  %v409_v27 = vadd.f32 %v965_v59, %v408_v52  ;;  %v423_v39 = vmul.f32 %v643_v21, %v422_v53  ;;  %v462_v42 = vor.u32 1.1754944e-38, %v461_v43 }
  0x48   :  { %v649_v63 = vpop.eup %648  ;;  %v398_v45 = vsel %vm1010_vm14, %v949_v54, %v394_v55  ;;  %v438_v47 = vmul.f32 %v645_v26, %v437_v17  ;;  %v452_v28 = vsub.f32 1.0, %v451_v62  ;;  %vm456_vm1 = vweird.f32 %v647_v49 }
  0x49   :  { %v413_v50 = vsel %vm1020_vm15, %v965_v59, %v409_v27  ;;  %v424_v43 = vadd.f32 %v643_v21, %v423_v39  ;;  %vm1250_vm3 = vweird.f32 %v915_v41  ;;  %v466_v40 = vmul.f32 %v649_v63, %v923_v60 }
  0x4a   :  { %vm1049_vm6 = vmor %vm1250_vm3, %vm441_vm8  ;;  %v474_v44 = vand.u32 2147483647, %v923_v60  ;;  %v1058_v51 = vsel %vm953_vm12, %v933_v46, %v383_v22  ;;  %v1063_v59 = vsel %vm957_vm13, %v938_v48, %v398_v45  ;;  %v439_v38 = vadd.f32 %v645_v26, %v438_v47 }
  0x4b   :  { %v453_v41 = vmul.f32 %v647_v49, %v452_v28  ;;  %v428_v52 = vsel %vm1039_vm10, %v643_v21, %v424_v43  ;;  %vm1253_vm11 = vweird.f32 %v920_v8  ;;  %v467_v55 = vsub.f32 1.0, %v466_v40 }
  0x4c   :  { %vm1069_vm14 = vmor %vm1253_vm11, %vm456_vm1  ;;  %vm471_vm7 = vweird.f32 %v649_v63  ;;  %v476_v46 = vand.u32 2147483648, %v923_v60  ;;  %v1077_v48 = vsel %vm976_vm2, %v961_v58, %v413_v50  ;;  %v443_v28 = vsel %vm1049_vm6, %v645_v26, %v439_v38 }
  0x4d   :  { %v454_v56 = vadd.f32 %v647_v49, %v453_v41  ;;  %650 = vrcp.f32 %v926_v11  ;;  %v1085_v8 = vsel %vm981_vm4, %v970_v14, %v428_v52  ;;  %v1089_v57 = vsel %vm985_vm5, %v447_v20, %v443_v28  ;;  %vm1099_vm13 = vmor %vm470_vm0, %vm471_vm7 }
  0x4e   :  { %v468_v21 = vmul.f32 %v649_v63, %v467_v55  ;;  %vm1091_vm12 = vcmp.eq.f32.partialorder %v474_v44, 8.507059e+37  ;;  %v477_v14 = vor.u32 1.1754944e-38, %v476_v46  ;;  %vm485_vm2 = vweird.f32 %v926_v11 }
  0x4f   :  { %v458_v58 = vsel %vm1069_vm14, %v647_v49, %v454_v56  ;;  %v489_v20 = vand.u32 2147483647, %v926_v11  ;;  %v496_v49 = vmul.f32 %v1063_v59, %v866_v35  ;;  %v497_v60 = vmul.f32 %v1077_v48, %v873_v36 }
  0x50   :  { %v1109_v23 = vsel %vm1025_vm9, %v462_v42, %v458_v58  ;;  %v469_v24 = vadd.f32 %v649_v63, %v468_v21  ;;  %v491_v13 = vand.u32 2147483648, %v926_v11  ;;  %v495_v17 = vmul.f32 %v1058_v51, %v809_v12 }
  0x51   :  { %v498_v62 = vmul.f32 %v1085_v8, %v877_v37  ;;  %v499_v18 = vmul.f32 %v1089_v57, %v881_v16  ;;  %v500_v36 = vmul.f32 %v1109_v23, %v885_v61  ;;  %v511_v22 = vrot.slane %v496_v49, 7 }
  0x52   :  { %v473_v35 = vsel %vm1099_vm13, %v649_v63, %v469_v24  ;;  %v512_v27 = vrot.slane %v497_v60, 6  ;;  %vm518_vm0 = vcmask 1040384   ;;  %vm1135_vm4 = vcmp.eq.f32.partialorder %v489_v20, 8.507059e+37 }
  0x53   :  { %v651_v39 = vpop.eup %650  ;;  %v1132_v12 = vsel %vm1091_vm12, %v477_v14, %v473_v35  ;;  %v513_v42 = vrot.slane %v498_v62, 5  ;;  %v514_v37 = vrot.slane %v499_v18, 4  ;;  %v515_v61 = vrot.slane %v500_v36, 3 }
  0x54   :  { %v481_v16 = vmul.f32 %v651_v39, %v926_v11  ;;  %v501_v63 = vmul.f32 %v1132_v12, %v903_v3  ;;  %v519_v25 = vsel %vm518_vm0, %v495_v17, %v511_v22  ;;  %vm520_vm5 = vcmask 1042434  }
  0x55   :  { %vm522_vm8 = vcmask 1041408   ;;  %vm524_vm15 = vcmask 1044484   ;;  %vm486_vm9 = vweird.f32 %v651_v39  ;;  %v492_v50 = vor.u32 1.1754944e-38, %v491_v13 }
  0x56   :  { %v482_v47 = vsub.f32 1.0, %v481_v16  ;;  %v521_v43 = vsel %vm520_vm5, %v512_v27, %v513_v42  ;;  %v516_v54 = vrot.slane %v501_v63, 2  ;;  %v525_v44 = vsel %vm524_vm15, %v514_v37, %v515_v61  ;;  %vm1149_vm3 = vmor %vm485_vm2, %vm486_vm9 }
  0x57   :  { %v523_v40 = vsel %vm522_vm8, %v519_v25, %v521_v43  ;;  %vm526_vm10 = vcmask 1046534   ;;  %vm528_vm1 = vcmask 1045508   ;;  %v152_v38 = vstv %s1105_s24 }
  0x58   :  { %v483_v3 = vmul.f32 %v651_v39, %v482_v47  ;;  %v162_v41 = vstv %s1115_s25  ;;  %vm530_vm6 = vcmask 1043456   ;;  %v153_v53 = vmul.f32 %v152_v38, %v743_v0 }
  0x59   :  { %v154_v55 = vmul.f32 %v152_v38, %v745_v1  ;;  %v155_v46 = vmul.f32 %v152_v38, %v747_v2  ;;  %v204_v28 = vstv %s1124_s26  ;;  %v156_v21 = vmul.f32 %v152_v38, %v749_v4 }
  0x5a   :  { %v484_v56 = vadd.f32 %v651_v39, %v483_v3  ;;  %v157_v19 = vmul.f32 %v152_v38, %v751_v5  ;;  %v158_v58 = vmul.f32 %v152_v38, %v753_v6  ;;  %v159_v11 = vmul.f32 %v152_v38, %v757_v9 }
  0x5b   :  { %v163_v26 = vmul.f32 %v162_v41, %v743_v0  ;;  %v164_v14 = vmul.f32 %v162_v41, %v745_v1  ;;  %v165_v20 = vmul.f32 %v162_v41, %v747_v2  ;;  %v166_v49 = vmul.f32 %v162_v41, %v749_v4 }
  0x5c   :  { %v488_v24 = vsel %vm1149_vm3, %v651_v39, %v484_v56  ;;  %v167_v60 = vmul.f32 %v162_v41, %v751_v5  ;;  %v168_v13 = vmul.f32 %v162_v41, %v753_v6  ;;  %v169_v62 = vmul.f32 %v162_v41, %v757_v9 }
  0x5d   :  { %v1171_v17 = vsel %vm1135_vm4, %v492_v50, %v488_v24  ;;  %v170_v18 = vmul.f32 %v162_v41, %v759_v10  ;;  %v179_v35 = vrot.slane %v163_v26, 1  ;;  %v180_v22 = vrot.slane %v164_v14, 1 }
  0x5e   :  { %v502_v36 = vmul.f32 %v1171_v17, %v907_v7  ;;  %v181_v27 = vrot.slane %v165_v20, 1  ;;  %v182_v39 = vrot.slane %v166_v49, 1  ;;  %v160_v42 = vmul.f32 %v152_v38, %v759_v10 }
  0x5f   :  { %v183_v37 = vrot.slane %v167_v60, 1  ;;  %v184_v16 = vrot.slane %v168_v13, 1  ;;  %v185_v45 = vrot.slane %v169_v62, 1  ;;  %v186_v61 = vrot.slane %v170_v18, 1 }
  0x60   :  { %v517_v63 = vrot.slane %v502_v36, 1  ;;  %v195_v25 = vadd.f32 %v179_v35, %v153_v53  ;;  %v196_v47 = vadd.f32 %v180_v22, %v154_v55  ;;  %v197_v50 = vadd.f32 %v181_v27, %v155_v46 }
  0x61   :  { %v198_v43 = vadd.f32 %v182_v39, %v156_v21  ;;  %v199_v3 = vadd.f32 %v183_v37, %v157_v19  ;;  %v200_v41 = vadd.f32 %v184_v16, %v158_v58  ;;  %v201_v52 = vadd.f32 %v185_v45, %v159_v11 }
  0x62   :  { %v527_v7 = vsel %vm526_vm10, %v516_v54, %v517_v63  ;;  %v205_v56 = vmul.f32 %v204_v28, %v743_v0  ;;  %v206_v26 = vmul.f32 %v204_v28, %v745_v1  ;;  %v207_v14 = vmul.f32 %v204_v28, %v747_v2 }
  0x63   :  { %v529_v38 = vsel %vm528_vm1, %v525_v44, %v527_v7  ;;  %v208_v20 = vmul.f32 %v204_v28, %v749_v4  ;;  %v209_v53 = vmul.f32 %v204_v28, %v751_v5  ;;  %v210_v46 = vmul.f32 %v204_v28, %v753_v6 }
  0x64   :  { %v531_v55 = vsel %vm530_vm6, %v523_v40, %v529_v38  ;;  %v211_v54 = vmul.f32 %v204_v28, %v757_v9  ;;  %v212_v21 = vmul.f32 %v204_v28, %v759_v10  ;;  %v202_v0 = vadd.f32 %v186_v61, %v160_v42 }
  0x65   :  { %533 = vst [vmem:[#allocation7] ss:$8 sm:$0xf] %v531_v55  ;;  %v221_v1 = vrot.slane %v205_v56, 2  ;;  %v222_v19 = vrot.slane %v206_v26, 2  ;;  %v223_v44 = vrot.slane %v207_v14, 2  ;;  %v246_v4 = vstv %s1177_s27 }
  0x66   :  { %534 = vst [vmem:[#allocation7] ss:$8 sm:$0xf0] %v531_v55  ;;  %v224_v2 = vrot.slane %v208_v20, 2  ;;  %v225_v58 = vrot.slane %v209_v53, 2  ;;  %v226_v11 = vrot.slane %v210_v46, 2 }
  0x67   :  { %v227_v24 = vrot.slane %v211_v54, 2  ;;  %v228_v5 = vrot.slane %v212_v21, 2  ;;  %v237_v49 = vadd.f32 %v221_v1, %v195_v25  ;;  %v238_v40 = vadd.f32 %v222_v19, %v196_v47  ;;  %v1264_v53 = vld [vmem:[#allocation11_spill] sm:$0xff] }
  0x68   :  { %v239_v60 = vadd.f32 %v223_v44, %v197_v50  ;;  %v240_v6 = vadd.f32 %v224_v2, %v198_v43  ;;  %v241_v13 = vadd.f32 %v225_v58, %v199_v3  ;;  %v242_v9 = vadd.f32 %v226_v11, %v200_v41 }
  0x69   :  { %v243_v62 = vadd.f32 %v227_v24, %v201_v52  ;;  %v244_v10 = vadd.f32 %v228_v5, %v202_v0  ;;  %v247_v28 = vadd.f32 %v246_v4, %v237_v49  ;;  %v248_v18 = vadd.f32 %v246_v4, %v238_v40 }
  0x6a   :  { %v249_v35 = vadd.f32 %v246_v4, %v239_v60  ;;  %v250_v36 = vadd.f32 %v246_v4, %v240_v6  ;;  %v251_v22 = vadd.f32 %v246_v4, %v241_v13  ;;  %v252_v27 = vadd.f32 %v246_v4, %v242_v9 }
  0x6b   :  { %v253_v39 = vadd.f32 %v246_v4, %v243_v62  ;;  %v254_v42 = vadd.f32 %v246_v4, %v244_v10  ;;  %v535_v37 = vmul.f32 %v1058_v51, %v247_v28  ;;  %v536_v16 = vmul.f32 %v1063_v59, %v248_v18 }
  0x6c   :  { %v537_v45 = vmul.f32 %v1077_v48, %v249_v35  ;;  %v538_v63 = vmul.f32 %v1085_v8, %v250_v36  ;;  %v539_v61 = vmul.f32 %v1089_v57, %v251_v22  ;;  %v540_v25 = vmul.f32 %v1109_v23, %v252_v27 }
  0x6d   :  { %v541_v47 = vmul.f32 %v1132_v12, %v253_v39  ;;  %v542_v50 = vmul.f32 %v1171_v17, %v254_v42  ;;  %v551_v43 = vrot.slane %v536_v16, 7  ;;  %v577_v3 = vrot.slane %v844_v15, 7 }
  0x6e   :  { %v552_v41 = vrot.slane %v537_v45, 6  ;;  %v553_v7 = vrot.slane %v538_v63, 5  ;;  %v554_v51 = vrot.slane %v539_v61, 4  ;;  %v555_v52 = vrot.slane %v540_v25, 3 }
  0x6f   :  { %v556_v59 = vrot.slane %v541_v47, 2  ;;  %v557_v56 = vrot.slane %v542_v50, 1  ;;  %v558_v48 = vsel %vm518_vm0, %v535_v37, %v551_v43  ;;  %v578_v8 = vrot.slane %v847_v29, 6 }
  0x70   :  { %v559_v57 = vsel %vm520_vm5, %v552_v41, %v553_v7  ;;  %v561_v23 = vsel %vm524_vm15, %v554_v51, %v555_v52  ;;  %v579_v12 = vrot.slane %v850_v30, 5  ;;  %v580_v17 = vrot.slane %v853_v31, 4 }
  0x71   :  { %v560_v15 = vsel %vm522_vm8, %v558_v48, %v559_v57  ;;  %v562_v26 = vsel %vm526_vm10, %v556_v59, %v557_v56  ;;  %v581_v38 = vrot.slane %v856_v32, 3  ;;  %v582_v14 = vrot.slane %v859_v33, 2 }
  0x72   :  { %v563_v20 = vsel %vm528_vm1, %v561_v23, %v562_v26  ;;  %v583_v29 = vrot.slane %v862_v34, 1  ;;  %v584_v55 = vsel %vm518_vm0, %v1264_v53, %v577_v3  ;;  %v585_v46 = vsel %vm520_vm5, %v578_v8, %v579_v12 }
  0x73   :  { %v564_v30 = vsel %vm530_vm6, %v560_v15, %v563_v20  ;;  %v586_v31 = vsel %vm522_vm8, %v584_v55, %v585_v46  ;;  %v587_v54 = vsel %vm524_vm15, %v580_v17, %v581_v38  ;;  %v720_v34 = vmov 0.0  }
  0x74   :  { %567 = vst [vmem:[#allocation7 + $0x1] ss:$8 sm:$0xf] %v564_v30  ;;  %v588_v32 = vsel %vm526_vm10, %v582_v14, %v583_v29 }
  0x75   :  { %568 = vst [vmem:[#allocation7 + $0x1] ss:$8 sm:$0xf0] %v564_v30  ;;  %v589_v33 = vsel %vm528_vm1, %v587_v54, %v588_v32 }
  0x76   :  { %v590_v21 = vsel %vm530_vm6, %v586_v31, %v589_v33  ;;  %595 = vst [vmem:[#allocation7] sm:$0xf8] %v720_v34 }
  0x77   :  { %593 = vst [vmem:[#allocation7 + $0x2] ss:$8 sm:$0xf] %v590_v21 }
  0x78   :  { %594 = vst [vmem:[#allocation7 + $0x2] ss:$8 sm:$0xf0] %v590_v21 }
  0x79   :  { %596 = vst [vmem:[#allocation7 + $0x8] sm:$0xf8] %v720_v34 }
  0x7a   :  { %597 = vst [vmem:[#allocation7 + $0x10] sm:$0xf8] %v720_v34 }
  0x7b   :  { %598 = vst [vmem:[#allocation7 + $0x18] sm:$0xf8] %v720_v34 }
  0x7c   :  { %599 = vst [vmem:[#allocation7 + $0x20] sm:$0xf8] %v720_v34 }
  0x7d   :  { %600 = vst [vmem:[#allocation7 + $0x28] sm:$0xf8] %v720_v34 }
  0x7e   :  { %601 = vst [vmem:[#allocation7 + $0x30] sm:$0xf8] %v720_v34 }
  0x7f   :  { %602 = vst [vmem:[#allocation7 + $0x38] sm:$0xf8] %v720_v34 }
  0x80   :  { %613 = dma.vmem_to_hbm [thread:$0]  %s609_s29, 1024, %s611_s4, [#allocation4]  }
  0x81   :  { %716 = dma.done.wait [#allocation4], 1024  }
  0x82   :  { %717 = vsyncadd [#allocation4], 4294966272 }
  0x83   :  { %618 = vsyncpa [#allocation3], 1 }
  0x84   :  { %619 = vsyncpa [#allocation4], 1 }
  0x85   :  { %620 = vsyncpa [#allocation5], 1 }

</bundles_post_ra>
